<compile_context>
chip_gen: v7x
topology: tpu7x:2x2x1
jax: 0.10.0
libtpu: 0.0.40
codegen_flags: <defaults>
</compile_context>

<pallas_src>
import jax
import jax.numpy as jnp
from jax.experimental import pallas as pl
from jax.experimental.pallas import tpu as pltpu

# ---- module constants (from PI_DeepONet.py) ----
BRANCH_H = 64
BRANCH_LAYERS = 3
FEATURE_SIZE = 16
NUM_OBS = 128
TRUNK_H = 64
TRUNK_LAYERS = 3


def _round_up(x, m):
    return ((x + m - 1) // m) * m


def trunk_kernel(t_ref, w0c, b0c, w1t, b1c, w2t, b2c, w3t, b3c, wsum, bsum,
                 out_ref):
    """Transposed trunk MLP + folded (fout, feature-sum) for one batch tile.

    Shapes inside the kernel (TB = batch tile, on the lane axis):
      t_ref: (1, TB)   w0c/b0c/b*c: (64, 1)   w*t: (64, 64)
      wsum:  (1, 64)   bsum: (1, 1)           out_ref: (1, TB)
    """
    f32 = jnp.float32
    t_row = t_ref[...]                                        # (1, TB)

    # Layer 0 (K = 1): broadcast outer product on the VPU.
    y = jnp.tanh(w0c[...] * t_row + b0c[...])                 # (64, TB)

    # Hidden layers: (64,64) @ (64,TB) on the MXU, tanh on the EUP.
    y = jnp.tanh(jnp.dot(w1t[...], y, preferred_element_type=f32) + b1c[...])
    y = jnp.tanh(jnp.dot(w2t[...], y, preferred_element_type=f32) + b2c[...])
    y = jnp.tanh(jnp.dot(w3t[...], y, preferred_element_type=f32) + b3c[...])

    # Folded final layer + feature sum: (1,64) @ (64,TB) + scalar -> (1,TB).
    out_ref[...] = jnp.dot(wsum[...], y, preferred_element_type=f32) + bsum[...]


def net_forward(u, t, params, *, tile_b=2048):
    """Net.forward.  u: (B, NUM_OBS) f32 (unused by the output, kept for API
    parity), t: (B, 1) f32, params: the full 20-array list (branch + trunk,
    weights laid out [in, out], biases [1, out]).  Returns (B, 1) f32."""
    del u  # the branch network is dead code w.r.t. the returned value
    B = t.shape[0]

    # Trunk params are the last 10 entries.
    tw0, tb0, tw1, tb1, tw2, tb2, tw3, tb3, two, tbo = params[10:20]

    # Transposed (feature-major) parameter views — cheap XLA-side reshapes.
    w0c = tw0.T                                   # (TRUNK_H, 1)
    b0c = tb0.T                                   # (TRUNK_H, 1)
    w1t, b1c = tw1.T, tb1.T                       # (64,64), (64,1)
    w2t, b2c = tw2.T, tb2.T
    w3t, b3c = tw3.T, tb3.T
    # Fold fout + sum-over-features: sum_j(y@W + b)_j == y @ W.sum(1) + b.sum()
    wsum = jnp.sum(two, axis=1).reshape(1, TRUNK_H)   # (1, TRUNK_H)
    bsum = jnp.sum(tbo).reshape(1, 1)                 # (1, 1)

    # Batch lives on the lane axis: tile must be a multiple of 128 lanes.
    tb = min(tile_b, _round_up(B, 128))
    Bp = _round_up(B, tb)
    t_row = t.reshape(1, B)                           # free: same flat layout
    if Bp != B:
        t_row = jnp.pad(t_row, ((0, 0), (0, Bp - B)))
    grid = (Bp // tb,)

    def resident(shape):
        # Full-array block, same tile every grid step -> stays VMEM-resident.
        return pl.BlockSpec(shape, lambda i: (0, 0))

    out_row = pl.pallas_call(
        trunk_kernel,
        out_shape=jax.ShapeDtypeStruct((1, Bp), jnp.float32),
        grid=grid,
        in_specs=[
            pl.BlockSpec((1, tb), lambda i: (0, i)),            # t tile (lanes)
            resident((TRUNK_H, 1)), resident((TRUNK_H, 1)),      # w0c, b0c
            resident((TRUNK_H, TRUNK_H)), resident((TRUNK_H, 1)),  # w1t, b1c
            resident((TRUNK_H, TRUNK_H)), resident((TRUNK_H, 1)),  # w2t, b2c
            resident((TRUNK_H, TRUNK_H)), resident((TRUNK_H, 1)),  # w3t, b3c
            resident((1, TRUNK_H)),                               # wsum
            resident((1, 1)),                                     # bsum
        ],
        out_specs=pl.BlockSpec((1, tb), lambda i: (0, i)),
        compiler_params=pltpu.CompilerParams(
            dimension_semantics=("parallel",)),
    )(t_row, w0c, b0c, w1t, b1c, w2t, b2c, w3t, b3c, wsum, bsum)

    # (1, Bp) -> (Bp, 1) is a free reshape; drop padding.
    return out_row.reshape(Bp, 1)[:B]


def init_params(key):
    """Deterministic synthetic params, weights laid out [in, out]."""
    def linear(k, fan_in, fan_out):
        kw, kb = jax.random.split(k)
        bound = 1.0 / jnp.sqrt(fan_in)
        w = jax.random.uniform(kw, (fan_in, fan_out), jnp.float32, -bound, bound)
        b = jax.random.uniform(kb, (1, fan_out), jnp.float32, -bound, bound)
        return w, b

    keys = jax.random.split(key, 10)
    params = []
    # branch: 128 -> 64, 3x (64 -> 64), 64 -> 16   (dead code for the output,
    # kept so the parameter list mirrors the PyTorch module)
    params += list(linear(keys[0], NUM_OBS, BRANCH_H))
    params += list(linear(keys[1], BRANCH_H, BRANCH_H))
    params += list(linear(keys[2], BRANCH_H, BRANCH_H))
    params += list(linear(keys[3], BRANCH_H, BRANCH_H))
    params += list(linear(keys[4], BRANCH_H, FEATURE_SIZE))
    # trunk: 1 -> 64, 3x (64 -> 64), 64 -> 16
    params += list(linear(keys[5], 1, TRUNK_H))
    params += list(linear(keys[6], TRUNK_H, TRUNK_H))
    params += list(linear(keys[7], TRUNK_H, TRUNK_H))
    params += list(linear(keys[8], TRUNK_H, TRUNK_H))
    params += list(linear(keys[9], TRUNK_H, FEATURE_SIZE))
    # Note: Net also has an unused scalar `bias` nn.Parameter; it never
    # participates in forward, so it is omitted.
    return params


def reference_forward(u, t, params):
    """Pure-JAX reference that mirrors the PyTorch forward exactly."""
    (bw0, bb0, bw1, bb1, bw2, bb2, bw3, bb3, bwo, bbo,
     tw0, tb0, tw1, tb1, tw2, tb2, tw3, tb3, two, tbo) = params
    x = jnp.tanh(u @ bw0 + bb0)
    x = jnp.tanh(x @ bw1 + bb1)
    x = jnp.tanh(x @ bw2 + bb2)
    x = jnp.tanh(x @ bw3 + bb3)
    b = x @ bwo + bbo
    y = jnp.tanh(t @ tw0 + tb0)
    y = jnp.tanh(y @ tw1 + tb1)
    y = jnp.tanh(y @ tw2 + tb2)
    y = jnp.tanh(y @ tw3 + tb3)
    tr = y @ two + tbo
    _bt = jnp.sum(b * tr, axis=1, keepdims=True)  # computed-but-unused, as in source
    return jnp.sum(tr, axis=1, keepdims=True)


if __name__ == "__main__":
    key = jax.random.PRNGKey(0)
    kp, ku, kt = jax.random.split(key, 3)

    B = 8  # small demo batch (kernel pads/tiles any B up to a multiple of 128 lanes)
    params = init_params(kp)
    u = jax.random.normal(ku, (B, NUM_OBS), jnp.float32)
    t = jax.random.normal(kt, (B, 1), jnp.float32)

    out = net_forward(u, t, params)
    out = jax.block_until_ready(out)

    ref = reference_forward(u, t, params)
    assert out.shape == (B, 1), out.shape
    # Folding fout + feature-sum reassociates a 16-term fp sum -> tiny tolerance.
    assert jnp.allclose(out, ref, atol=1e-4, rtol=1e-4), (out, ref)
    print("KERNEL_OK")
</pallas_src>

<mosaic_0001>
module attributes {stable_mosaic.version = 11 : i64} {
  func.func @trunk_kernel(%arg0: i32, %arg1: memref<1x128xf32, #tpu.memory_space<vmem>>, %arg2: memref<64x1xf32, #tpu.memory_space<vmem>>, %arg3: memref<64x1xf32, #tpu.memory_space<vmem>>, %arg4: memref<64x64xf32, #tpu.memory_space<vmem>>, %arg5: memref<64x1xf32, #tpu.memory_space<vmem>>, %arg6: memref<64x64xf32, #tpu.memory_space<vmem>>, %arg7: memref<64x1xf32, #tpu.memory_space<vmem>>, %arg8: memref<64x64xf32, #tpu.memory_space<vmem>>, %arg9: memref<64x1xf32, #tpu.memory_space<vmem>>, %arg10: memref<1x64xf32, #tpu.memory_space<vmem>>, %arg11: memref<1x1xf32, #tpu.memory_space<vmem>>, %arg12: memref<1x128xf32, #tpu.memory_space<vmem>>) attributes {dimension_semantics = [#tpu.dimension_semantics<parallel>], iteration_bounds = array<i64: 1>, scalar_prefetch = 0 : i64, scratch_operands = 0 : i64, tpu.core_type = #tpu.core_type<tc>, window_params = [{transform_indices = @transform_0, window_bounds = array<i64: 1, 128>}, {pipeline_mode = #tpu.pipeline_mode<synchronous>, transform_indices = @transform_1, window_bounds = array<i64: 64, 1>}, {pipeline_mode = #tpu.pipeline_mode<synchronous>, transform_indices = @transform_2, window_bounds = array<i64: 64, 1>}, {pipeline_mode = #tpu.pipeline_mode<synchronous>, transform_indices = @transform_3, window_bounds = array<i64: 64, 64>}, {pipeline_mode = #tpu.pipeline_mode<synchronous>, transform_indices = @transform_4, window_bounds = array<i64: 64, 1>}, {pipeline_mode = #tpu.pipeline_mode<synchronous>, transform_indices = @transform_5, window_bounds = array<i64: 64, 64>}, {pipeline_mode = #tpu.pipeline_mode<synchronous>, transform_indices = @transform_6, window_bounds = array<i64: 64, 1>}, {pipeline_mode = #tpu.pipeline_mode<synchronous>, transform_indices = @transform_7, window_bounds = array<i64: 64, 64>}, {pipeline_mode = #tpu.pipeline_mode<synchronous>, transform_indices = @transform_8, window_bounds = array<i64: 64, 1>}, {pipeline_mode = #tpu.pipeline_mode<synchronous>, transform_indices = @transform_9, window_bounds = array<i64: 1, 64>}, {pipeline_mode = #tpu.pipeline_mode<synchronous>, transform_indices = @transform_10, window_bounds = array<i64: 1, 1>}, {transform_indices = @transform_11, window_bounds = array<i64: 1, 128>}]} {
    %c0 = arith.constant 0 : index
    %c0_0 = arith.constant 0 : index
    %0 = vector.load %arg1[%c0, %c0_0] : memref<1x128xf32, #tpu.memory_space<vmem>>, vector<1x128xf32>
    %c0_1 = arith.constant 0 : index
    %c0_2 = arith.constant 0 : index
    %1 = vector.load %arg2[%c0_1, %c0_2] : memref<64x1xf32, #tpu.memory_space<vmem>>, vector<64x1xf32>
    %2 = vector.broadcast %1 : vector<64x1xf32> to vector<64x128xf32>
    %3 = vector.broadcast %0 : vector<1x128xf32> to vector<64x128xf32>
    %4 = arith.mulf %2, %3 : vector<64x128xf32>
    %c0_3 = arith.constant 0 : index
    %c0_4 = arith.constant 0 : index
    %5 = vector.load %arg3[%c0_3, %c0_4] : memref<64x1xf32, #tpu.memory_space<vmem>>, vector<64x1xf32>
    %6 = vector.broadcast %5 : vector<64x1xf32> to vector<64x128xf32>
    %7 = arith.addf %4, %6 : vector<64x128xf32>
    %8 = math.tanh %7 : vector<64x128xf32>
    %c0_5 = arith.constant 0 : index
    %c0_6 = arith.constant 0 : index
    %9 = vector.load %arg4[%c0_5, %c0_6] : memref<64x64xf32, #tpu.memory_space<vmem>>, vector<64x64xf32>
    %cst = arith.constant dense<0.000000e+00> : vector<64x128xf32>
    %10 = tpu.matmul %9, %8, %cst {dimension_numbers = #tpu.dot_dimension_numbers<[1], [0], [0], [1], [0, 0, 1, 1], [], []>} : vector<64x64xf32>, vector<64x128xf32>, vector<64x128xf32> -> vector<64x128xf32>
    %c0_7 = arith.constant 0 : index
    %c0_8 = arith.constant 0 : index
    %11 = vector.load %arg5[%c0_7, %c0_8] : memref<64x1xf32, #tpu.memory_space<vmem>>, vector<64x1xf32>
    %12 = vector.broadcast %11 : vector<64x1xf32> to vector<64x128xf32>
    %13 = arith.addf %10, %12 : vector<64x128xf32>
    %14 = math.tanh %13 : vector<64x128xf32>
    %c0_9 = arith.constant 0 : index
    %c0_10 = arith.constant 0 : index
    %15 = vector.load %arg6[%c0_9, %c0_10] : memref<64x64xf32, #tpu.memory_space<vmem>>, vector<64x64xf32>
    %cst_11 = arith.constant dense<0.000000e+00> : vector<64x128xf32>
    %16 = tpu.matmul %15, %14, %cst_11 {dimension_numbers = #tpu.dot_dimension_numbers<[1], [0], [0], [1], [0, 0, 1, 1], [], []>} : vector<64x64xf32>, vector<64x128xf32>, vector<64x128xf32> -> vector<64x128xf32>
    %c0_12 = arith.constant 0 : index
    %c0_13 = arith.constant 0 : index
    %17 = vector.load %arg7[%c0_12, %c0_13] : memref<64x1xf32, #tpu.memory_space<vmem>>, vector<64x1xf32>
    %18 = vector.broadcast %17 : vector<64x1xf32> to vector<64x128xf32>
    %19 = arith.addf %16, %18 : vector<64x128xf32>
    %20 = math.tanh %19 : vector<64x128xf32>
    %c0_14 = arith.constant 0 : index
    %c0_15 = arith.constant 0 : index
    %21 = vector.load %arg8[%c0_14, %c0_15] : memref<64x64xf32, #tpu.memory_space<vmem>>, vector<64x64xf32>
    %cst_16 = arith.constant dense<0.000000e+00> : vector<64x128xf32>
    %22 = tpu.matmul %21, %20, %cst_16 {dimension_numbers = #tpu.dot_dimension_numbers<[1], [0], [0], [1], [0, 0, 1, 1], [], []>} : vector<64x64xf32>, vector<64x128xf32>, vector<64x128xf32> -> vector<64x128xf32>
    %c0_17 = arith.constant 0 : index
    %c0_18 = arith.constant 0 : index
    %23 = vector.load %arg9[%c0_17, %c0_18] : memref<64x1xf32, #tpu.memory_space<vmem>>, vector<64x1xf32>
    %24 = vector.broadcast %23 : vector<64x1xf32> to vector<64x128xf32>
    %25 = arith.addf %22, %24 : vector<64x128xf32>
    %26 = math.tanh %25 : vector<64x128xf32>
    %c0_19 = arith.constant 0 : index
    %c0_20 = arith.constant 0 : index
    %27 = vector.load %arg10[%c0_19, %c0_20] : memref<1x64xf32, #tpu.memory_space<vmem>>, vector<1x64xf32>
    %cst_21 = arith.constant dense<0.000000e+00> : vector<1x128xf32>
    %28 = tpu.matmul %27, %26, %cst_21 {dimension_numbers = #tpu.dot_dimension_numbers<[1], [0], [0], [1], [0, 0, 1, 1], [], []>} : vector<1x64xf32>, vector<64x128xf32>, vector<1x128xf32> -> vector<1x128xf32>
    %c0_22 = arith.constant 0 : index
    %c0_23 = arith.constant 0 : index
    %29 = vector.load %arg11[%c0_22, %c0_23] : memref<1x1xf32, #tpu.memory_space<vmem>>, vector<1x1xf32>
    %30 = vector.broadcast %29 : vector<1x1xf32> to vector<1x128xf32>
    %31 = arith.addf %28, %30 : vector<1x128xf32>
    %c0_24 = arith.constant 0 : index
    %c0_25 = arith.constant 0 : index
    %32 = vector.load %arg12[%c0_24, %c0_25] : memref<1x128xf32, #tpu.memory_space<vmem>>, vector<1x128xf32>
    tpu.vector_store %arg12[%c0_24, %c0_25], %31 {strides = array<i32>} : memref<1x128xf32, #tpu.memory_space<vmem>>, vector<1x128xf32>,
    return
  }
  func.func @transform_0(%arg0: i32) -> (i32, i32) {
    %c0_i32 = arith.constant 0 : i32
    %c0_i32_0 = arith.constant 0 : i32
    return %c0_i32, %arg0 : i32, i32
  }
  func.func @transform_1(%arg0: i32) -> (i32, i32) {
    %c0_i32 = arith.constant 0 : i32
    %c0_i32_0 = arith.constant 0 : i32
    %c0_i32_1 = arith.constant 0 : i32
    return %c0_i32, %c0_i32_0 : i32, i32
  }
  func.func @transform_2(%arg0: i32) -> (i32, i32) {
    %c0_i32 = arith.constant 0 : i32
    %c0_i32_0 = arith.constant 0 : i32
    %c0_i32_1 = arith.constant 0 : i32
    return %c0_i32, %c0_i32_0 : i32, i32
  }
  func.func @transform_3(%arg0: i32) -> (i32, i32) {
    %c0_i32 = arith.constant 0 : i32
    %c0_i32_0 = arith.constant 0 : i32
    %c0_i32_1 = arith.constant 0 : i32
    return %c0_i32, %c0_i32_0 : i32, i32
  }
  func.func @transform_4(%arg0: i32) -> (i32, i32) {
    %c0_i32 = arith.constant 0 : i32
    %c0_i32_0 = arith.constant 0 : i32
    %c0_i32_1 = arith.constant 0 : i32
    return %c0_i32, %c0_i32_0 : i32, i32
  }
  func.func @transform_5(%arg0: i32) -> (i32, i32) {
    %c0_i32 = arith.constant 0 : i32
    %c0_i32_0 = arith.constant 0 : i32
    %c0_i32_1 = arith.constant 0 : i32
    return %c0_i32, %c0_i32_0 : i32, i32
  }
  func.func @transform_6(%arg0: i32) -> (i32, i32) {
    %c0_i32 = arith.constant 0 : i32
    %c0_i32_0 = arith.constant 0 : i32
    %c0_i32_1 = arith.constant 0 : i32
    return %c0_i32, %c0_i32_0 : i32, i32
  }
  func.func @transform_7(%arg0: i32) -> (i32, i32) {
    %c0_i32 = arith.constant 0 : i32
    %c0_i32_0 = arith.constant 0 : i32
    %c0_i32_1 = arith.constant 0 : i32
    return %c0_i32, %c0_i32_0 : i32, i32
  }
  func.func @transform_8(%arg0: i32) -> (i32, i32) {
    %c0_i32 = arith.constant 0 : i32
    %c0_i32_0 = arith.constant 0 : i32
    %c0_i32_1 = arith.constant 0 : i32
    return %c0_i32, %c0_i32_0 : i32, i32
  }
  func.func @transform_9(%arg0: i32) -> (i32, i32) {
    %c0_i32 = arith.constant 0 : i32
    %c0_i32_0 = arith.constant 0 : i32
    %c0_i32_1 = arith.constant 0 : i32
    return %c0_i32, %c0_i32_0 : i32, i32
  }
  func.func @transform_10(%arg0: i32) -> (i32, i32) {
    %c0_i32 = arith.constant 0 : i32
    %c0_i32_0 = arith.constant 0 : i32
    %c0_i32_1 = arith.constant 0 : i32
    return %c0_i32, %c0_i32_0 : i32, i32
  }
  func.func @transform_11(%arg0: i32) -> (i32, i32) {
    %c0_i32 = arith.constant 0 : i32
    %c0_i32_0 = arith.constant 0 : i32
    return %c0_i32, %arg0 : i32, i32
  }
}

</mosaic_0001>

<bundles_post_ra>
// kernel: tpu_custom_call.1
= control target key start
LH: loop header
LB: loop body
LE: loop exit
PB: predicated region body
PF: predicated region fallthrough
CT: control target
= control target key end

     0   :  { %s1491_s0 = inlined_call_operand.vmem [shape: f32[1,128], index: 0, kind: input, shape index: {}]   ;;  %s1492_s1 = inlined_call_operand.vmem [shape: f32[64,1], index: 1, kind: input, shape index: {}]   ;;  %s1493_s2 = inlined_call_operand.vmem [shape: f32[64,1], index: 2, kind: input, shape index: {}]   ;;  %s1494_s3 = inlined_call_operand.vmem [shape: f32[64,64], index: 3, kind: input, shape index: {}]   ;;  %s1495_s4 = inlined_call_operand.vmem [shape: f32[64,1], index: 4, kind: input, shape index: {}]   ;;  %s1496_s5 = inlined_call_operand.vmem [shape: f32[64,64], index: 5, kind: input, shape index: {}]   ;;  %s1497_s6 = inlined_call_operand.vmem [shape: f32[64,1], index: 6, kind: input, shape index: {}]   ;;  %s1498_s7 = inlined_call_operand.vmem [shape: f32[64,64], index: 7, kind: input, shape index: {}]   ;;  %s1499_s8 = inlined_call_operand.vmem [shape: f32[64,1], index: 8, kind: input, shape index: {}]   ;;  %s1500_s9 = inlined_call_operand.vmem [shape: f32[1,64], index: 9, kind: input, shape index: {}]   ;;  %s1501_s10 = inlined_call_operand.<no memory space> [shape: f32[1,1], index: 10, kind: input, shape index: {}]   ;;  %s1502_s11 = inlined_call_operand.hbm [shape: f32[1,128], index: 11, kind: output, shape index: {}]  }
   0x1   :  { %v16_v0 = vstv %s1501_s10 }
   0x2   :  { %17 = vst [vmem:[#allocation2] sm:$0x1] %v16_v0 }
   0x3   :  { %v104_v1 = vld [vmem:[%s1493_s2] sm:$0xff]  ;;  %v1188_v3 = vmov 0   ;;  %v105_v4 = vld [vmem:[%s1493_s2 + $0x8] sm:$0xff]  ;;  %v45_v6 = vld [vmem:[%s1492_s1 + $0x18] sm:$0xff] }
   0x4   :  { %v42_v2 = vld [vmem:[%s1492_s1] sm:$0xff]  ;;  %1099 = vset.pattern.permute.xlu1 %v1188_v3  ;;  %1098 = vset.pattern.permute.xlu0 %v1188_v3  ;;  %v43_v5 = vld [vmem:[%s1492_s1 + $0x8] sm:$0xff]  ;;  %v44_v7 = vld [vmem:[%s1492_s1 + $0x10] sm:$0xff] }
   0x5   :  { %114 = vperm.xlu1 %1099, %v104_v1   ;;  %52 = vperm.xlu0 %1098, %v42_v2   ;;  %v107_v8 = vld [vmem:[%s1493_s2 + $0x18] sm:$0xff]  ;;  %v106_v9 = vld [vmem:[%s1493_s2 + $0x10] sm:$0xff] }
   0x9   :  { %119 = vperm.xlu1 %1099, %v105_v4   ;;  %57 = vperm.xlu0 %1098, %v43_v5  }
   0xd   :  { %67 = vperm.xlu1 %1099, %v45_v6   ;;  %62 = vperm.xlu0 %1098, %v44_v7  }
  0x11   :  { %129 = vperm.xlu1 %1099, %v107_v8   ;;  %124 = vperm.xlu0 %1098, %v106_v9  }
  0x12   :  { %18 = vsyncpa [#allocation4], 0  ;;  %v47_v10 = vld [vmem:[%s1492_s1 + $0x28] sm:$0xff]  ;;  %v46_v11 = vld [vmem:[%s1492_s1 + $0x20] sm:$0xff]  ;;  %vm224_vm0 = vcmask 523264   ;;  %vm1190_vm1 = vmmov 0  }
  0x13   :  { %v109_v12 = vld [vmem:[%s1493_s2 + $0x28] sm:$0xff]  ;;  %v108_v13 = vld [vmem:[%s1493_s2 + $0x20] sm:$0xff]  ;;  %v49_v14 = vld [vmem:[%s1492_s1 + $0x38] sm:$0xff]  ;;  %s1192_s28 = smov [#allocation3]  }
  0x14   :  { %v48_v15 = vld [vmem:[%s1492_s1 + $0x30] sm:$0xff]  ;;  %v111_v16 = vld [vmem:[%s1493_s2 + $0x38] sm:$0xff]  ;;  %v177_v18 = vld [vmem:[%s1495_s4 + $0x8] sm:$0xff]  ;;  %s839_s29 = sshll.u32 %s1192_s28, 4  ;;  %s840_s29 = int_to_ptr.vmem [resolvable:$true] %s839_s29 }
  0x15   :  { %77 = vperm.xlu1 %1099, %v47_v10   ;;  %72 = vperm.xlu0 %1098, %v46_v11   ;;  %v110_v17 = vld [vmem:[%s1493_s2 + $0x30] sm:$0xff]  ;;  %v176_v19 = vld [vmem:[%s1495_s4] sm:$0xff]  ;;  %v179_v20 = vld [vmem:[%s1495_s4 + $0x18] sm:$0xff]  ;;  %s1168_s30 = scalar_lea.vmem %s840_s29, 32  ;;  %p1169_p1 = scmp.lt.s32.totalorder %s840_s29, %s840_s29 }
  0x16   :  { %v178_v21 = vld [vmem:[%s1495_s4 + $0x10] sm:$0xff]  ;;  %v181_v22 = vld [vmem:[%s1495_s4 + $0x28] sm:$0xff]  ;;  %v180_v23 = vld [vmem:[%s1495_s4 + $0x20] sm:$0xff] }
  0x17   :  { %v183_v24 = vld [vmem:[%s1495_s4 + $0x38] sm:$0xff]  ;;  %v182_v25 = vld [vmem:[%s1495_s4 + $0x30] sm:$0xff]  ;;  %v371_v26 = vld [vmem:[%s1497_s6 + $0x8] sm:$0xff]  ;;  %s1164_s4 = scalar_lea.vmem %s840_s29, 16 }
  0x18   :  { %v370_v27 = vld [vmem:[%s1497_s6] sm:$0xff]  ;;  %v373_v29 = vld [vmem:[%s1497_s6 + $0x18] sm:$0xff]  ;;  %v372_v30 = vld [vmem:[%s1497_s6 + $0x10] sm:$0xff]  ;;  %p1165_p0 = scmp.ne.s32.totalorder %s840_s29, %s1164_s4  ;;  %p1170_p2 = scmp.lt.s32.totalorder %s1168_s30, %s1164_s4 }
  0x19   :  { %139 = vperm.xlu1 %1099, %v109_v12   ;;  %134 = vperm.xlu0 %1098, %v108_v13   ;;  %v168_v28 = vld [vmem:[%s1494_s3] sm:$0xff]  ;;  %v375_v31 = vld [vmem:[%s1497_s6 + $0x28] sm:$0xff]  ;;  %v377_v33 = vld [vmem:[%s1497_s6 + $0x38] sm:$0xff] }
  0x1a   :  { %946 = vmatprep.mubr.msk.f32.mxu0 %vm224_vm0, %v168_v28  ;;  %v374_v32 = vld [vmem:[%s1497_s6 + $0x20] sm:$0xff]  ;;  %v376_v34 = vld [vmem:[%s1497_s6 + $0x30] sm:$0xff]  ;;  %v564_v35 = vld [vmem:[%s1499_s8 + $0x8] sm:$0xff]  ;;  %p1171_p3 = por %p1170_p2, %p1169_p1 }
  0x1b   :  { %v563_v36 = vld [vmem:[%s1499_s8] sm:$0xff]  ;;  %v566_v37 = vld [vmem:[%s1499_s8 + $0x18] sm:$0xff]  ;;  %v565_v38 = vld [vmem:[%s1499_s8 + $0x10] sm:$0xff] }
  0x1c   :  { %v568_v39 = vld [vmem:[%s1499_s8 + $0x28] sm:$0xff]  ;;  %v567_v40 = vld [vmem:[%s1499_s8 + $0x20] sm:$0xff]  ;;  %v570_v41 = vld [vmem:[%s1499_s8 + $0x38] sm:$0xff]  ;;  %p1172_p4 = pnand %p1171_p3, %p1165_p0 }
  0x1d   :  { %87 = vperm.xlu1 %1099, %v49_v14   ;;  %82 = vperm.xlu0 %1098, %v48_v15   ;;  %v569_v42 = vld [vmem:[%s1499_s8 + $0x30] sm:$0xff]  ;;  %v749_v43 = vld [vmem:[#allocation2] sm:$0x1] }
  0x1e   :  { %v847_v44 = vld [vmem:[%s1491_s0] ss:$0 sm:$0xff] }
  0x1f   :  { %v172_v28 = vld [vmem:[%s1494_s3 + $0x20] sm:$0xff] }
  0x21   :  { %149 = vperm.xlu1 %1099, %v111_v16   ;;  %144 = vperm.xlu0 %1098, %v110_v17  }
  0x25   :  { %191 = vperm.xlu1 %1099, %v177_v18   ;;  %186 = vperm.xlu0 %1098, %v176_v19  }
  0x29   :  { %201 = vperm.xlu1 %1099, %v179_v20   ;;  %196 = vperm.xlu0 %1098, %v178_v21  }
  0x2d   :  { %211 = vperm.xlu1 %1099, %v181_v22   ;;  %206 = vperm.xlu0 %1098, %v180_v23  }
  0x31   :  { %221 = vperm.xlu1 %1099, %v183_v24   ;;  %216 = vperm.xlu0 %1098, %v182_v25   ;;  %v169_v25 = vld [vmem:[%s1494_s3 + $0x8] sm:$0xff] }
  0x35   :  { %385 = vperm.xlu1 %1099, %v371_v26   ;;  %380 = vperm.xlu0 %1098, %v370_v27   ;;  %v170_v26 = vld [vmem:[%s1494_s3 + $0x10] sm:$0xff]  ;;  %v171_v27 = vld [vmem:[%s1494_s3 + $0x18] sm:$0xff] }
  0x39   :  { %395 = vperm.xlu1 %1099, %v373_v29   ;;  %390 = vperm.xlu0 %1098, %v372_v30   ;;  %v173_v29 = vld [vmem:[%s1494_s3 + $0x28] sm:$0xff]  ;;  %v174_v30 = vld [vmem:[%s1494_s3 + $0x30] sm:$0xff] }
  0x3d   :  { %405 = vperm.xlu1 %1099, %v375_v31   ;;  %400 = vperm.xlu0 %1098, %v374_v32   ;;  %v175_v31 = vld [vmem:[%s1494_s3 + $0x38] sm:$0xff]  ;;  %v362_v32 = vld [vmem:[%s1496_s5] sm:$0xff] }
  0x3e   :  { %974 = vmatprep.mubr.msk.f32.mxu1 %vm224_vm0, %v362_v32 }
  0x41   :  { %415 = vperm.xlu1 %1099, %v377_v33   ;;  %410 = vperm.xlu0 %1098, %v376_v34  }
  0x45   :  { %578 = vperm.xlu1 %1099, %v564_v35   ;;  %573 = vperm.xlu0 %1098, %v563_v36  }
  0x49   :  { %588 = vperm.xlu1 %1099, %v566_v37   ;;  %583 = vperm.xlu0 %1098, %v565_v38  }
  0x4d   :  { %598 = vperm.xlu1 %1099, %v568_v39   ;;  %593 = vperm.xlu0 %1098, %v567_v40  }
  0x51   :  { %608 = vperm.xlu1 %1099, %v570_v41   ;;  %603 = vperm.xlu0 %1098, %v569_v42  }
  0x55   :  { %752 = vperm.xlu0 %1098, %v749_v43  }
  0x84   :  { %v115_v45 = vpop.permute.xlu1 %114  ;;  %v53_v46 = vpop.permute.xlu0 %52 }
  0x85   :  { %v96_v47 = vmul.f32 %v847_v44, %v53_v46 }
  0x87   :  { %v152_v48 = vadd.f32 %v115_v45, %v96_v47 }
  0x88   :  { %v120_v49 = vpop.permute.xlu1 %119  ;;  %v58_v50 = vpop.permute.xlu0 %57 }
  0x89   :  { %v97_v51 = vmul.f32 %v847_v44, %v58_v50  ;;  %1100 = vtanh.f32 %v152_v48 }
  0x8b   :  { %v153_v52 = vadd.f32 %v120_v49, %v97_v51 }
  0x8c   :  { %v68_v53 = vpop.permute.xlu1 %67  ;;  %v63_v54 = vpop.permute.xlu0 %62 }
  0x8d   :  { %1102 = vtanh.f32 %v153_v52  ;;  %v99_v55 = vmul.f32 %v847_v44, %v68_v53  ;;  %v98_v56 = vmul.f32 %v847_v44, %v63_v54 }
  0x90   :  { %v130_v57 = vpop.permute.xlu1 %129  ;;  %v125_v58 = vpop.permute.xlu0 %124 }
  0x91   :  { %v155_v59 = vadd.f32 %v130_v57, %v99_v55  ;;  %v154_v60 = vadd.f32 %v125_v58, %v98_v56 }
  0x93   :  { %1104 = vtanh.f32 %v155_v59  ;;  %v1101_v63 = vpop.eup %1100 }
  0x94   :  { %1106 = vtanh.f32 %v154_v60  ;;  %v78_v61 = vpop.permute.xlu1 %77  ;;  %v73_v62 = vpop.permute.xlu0 %72 }
  0x95   :  { %v101_v1 = vmul.f32 %v847_v44, %v78_v61  ;;  %v100_v2 = vmul.f32 %v847_v44, %v73_v62 }
  0x97   :  { %v1103_v0 = vpop.eup %1102 }
  0x98   :  { %v140_v3 = vpop.permute.xlu1 %139  ;;  %v135_v4 = vpop.permute.xlu0 %134  ;;  %v1033_v5 = vpack.c.bf16 %v1103_v0, %v1101_v63 }
  0x99   :  { %v157_v6 = vadd.f32 %v140_v3, %v101_v1  ;;  %v156_v7 = vadd.f32 %v135_v4, %v100_v2 }
  0x9a   :  { %1034 = vmatprep.subr.bf16.mxu0 %v1033_v5 }
  0x9b   :  { %1108 = vtanh.f32 %v157_v6  ;;  %1036 = vmatpush3.bf16.msra.mxu0 %v1033_v5  ;;  %v363_v5 = vld [vmem:[%s1496_s5 + $0x8] sm:$0xff]  ;;  %v364_v6 = vld [vmem:[%s1496_s5 + $0x10] sm:$0xff] }
  0x9c   :  { %1110 = vtanh.f32 %v156_v7  ;;  %v88_v8 = vpop.permute.xlu1 %87  ;;  %v83_v9 = vpop.permute.xlu0 %82  ;;  %v365_v7 = vld [vmem:[%s1496_s5 + $0x18] sm:$0xff] }
  0x9d   :  { %v1105_v10 = vpop.eup %1104  ;;  %v103_v12 = vmul.f32 %v847_v44, %v88_v8  ;;  %v102_v13 = vmul.f32 %v847_v44, %v83_v9  ;;  %v366_v8 = vld [vmem:[%s1496_s5 + $0x20] sm:$0xff]  ;;  %v367_v9 = vld [vmem:[%s1496_s5 + $0x28] sm:$0xff] }
  0x9e   :  { %v1107_v11 = vpop.eup %1106 }
  0x9f   :  { %v1037_v14 = vpack.c.bf16 %v1105_v10, %v1107_v11  ;;  %v368_v10 = vld [vmem:[%s1496_s5 + $0x30] sm:$0xff]  ;;  %v369_v11 = vld [vmem:[%s1496_s5 + $0x38] sm:$0xff] }
  0xa0   :  { %v150_v15 = vpop.permute.xlu1 %149  ;;  %v145_v16 = vpop.permute.xlu0 %144 }
  0xa1   :  { %v159_v17 = vadd.f32 %v150_v15, %v103_v12  ;;  %v158_v18 = vadd.f32 %v145_v16, %v102_v13  ;;  %1038 = vmatprep.subr.bf16.mxu0 %v1037_v14  ;;  %v555_v12 = vld [vmem:[%s1498_s7] sm:$0xff] }
  0xa2   :  { %1040 = vmatpush3.bf16.msra.mxu0 %v1037_v14 }
  0xa3   :  { %1112 = vtanh.f32 %v159_v17 }
  0xa4   :  { %1114 = vtanh.f32 %v158_v18  ;;  %v192_v33 = vpop.permute.xlu1 %191  ;;  %v187_v34 = vpop.permute.xlu0 %186 }
  0xa5   :  { %v1109_v19 = vpop.eup %1108 }
  0xa6   :  { %v1111_v20 = vpop.eup %1110 }
  0xa7   :  { %v1041_v21 = vpack.c.bf16 %v1109_v19, %v1111_v20 }
  0xa8   :  { %v202_v35 = vpop.permute.xlu1 %201  ;;  %v197_v37 = vpop.permute.xlu0 %196 }
  0xa9   :  { %1042 = vmatprep.subr.bf16.mxu0 %v1041_v21 }
  0xaa   :  { %1044 = vmatpush3.bf16.msra.mxu0 %v1041_v21 }
  0xac   :  { %v212_v44 = vpop.permute.xlu1 %211  ;;  %v207_v46 = vpop.permute.xlu0 %206 }
  0xad   :  { %v1113_v22 = vpop.eup %1112 }
  0xae   :  { %v1115_v23 = vpop.eup %1114 }
  0xaf   :  { %v1045_v24 = vpack.c.bf16 %v1113_v22, %v1115_v23 }
  0xb0   :  { %v222_v51 = vpop.permute.xlu1 %221  ;;  %v217_v54 = vpop.permute.xlu0 %216 }
  0xb1   :  { %1046 = vmatprep.subr.bf16.mxu0 %v1045_v24 }
  0xb2   :  { %1048 = vmatpush3.bf16.msra.mxu0 %v1045_v24 }
  0xb4   :  { %v386_v13 = vpop.permute.xlu1 %385  ;;  %v381_v14 = vpop.permute.xlu0 %380 }
  0xb5   :  { %947 = vmatmul.mubr.msk.f32.vlgmr.msra.gmra.mrb[0].mxu0 %vm224_vm0, %v169_v25 }
  0xb6   :  { %949 = vmatprep.mubr.msk.f32.mxu0 %vm224_vm0, %v170_v26 }
  0xb8   :  { %v396_v15 = vpop.permute.xlu1 %395  ;;  %v391_v17 = vpop.permute.xlu0 %390 }
  0xb9   :  { %950 = vmatmul.mubr.msk.f32.gmra.mrb[2].mxu0 %vm224_vm0, %v171_v27 }
  0xba   :  { %952 = vmatprep.mubr.msk.f32.mxu0 %vm224_vm0, %v172_v28 }
  0xbc   :  { %v406_v24 = vpop.permute.xlu1 %405  ;;  %v401_v26 = vpop.permute.xlu0 %400 }
  0xbd   :  { %953 = vmatmul.mubr.msk.f32.gmra.mrb[4].mxu0 %vm224_vm0, %v173_v29 }
  0xbe   :  { %955 = vmatprep.mubr.msk.f32.mxu0 %vm224_vm0, %v174_v30 }
  0xc1   :  { %956 = vmatmul.mubr.msk.f32.gmra.mrb[6].mxu0 %vm224_vm0, %v175_v31  ;;  %v416_v31 = vpop.permute.xlu1 %415 }
  0xc2   :  { %1002 = vmatprep.mubr.msk.f32.mxu0 %vm224_vm0, %v555_v12 }
 0x188   :  { %v948_v36 = vpop.f32.mrb[0].mxu0 }
 0x189   :  { %v321_v38 = vadd.f32 %v948_v36, %v192_v33  ;;  %v315_v39 = vpop.f32.mrb[1].mxu0 }
 0x18a   :  { %v316_v40 = vadd.f32 %v315_v39, %v187_v34  ;;  %v411_v34 = vpop.permute.xlu0 %410 }
 0x18b   :  { %1116 = vtanh.f32 %v321_v38 }
 0x18c   :  { %1118 = vtanh.f32 %v316_v40  ;;  %v951_v41 = vpop.f32.mrb[2].mxu0 }
 0x18d   :  { %v331_v42 = vadd.f32 %v951_v41, %v202_v35  ;;  %v325_v43 = vpop.f32.mrb[3].mxu0 }
 0x18e   :  { %v326_v45 = vadd.f32 %v325_v43, %v197_v37 }
 0x18f   :  { %1120 = vtanh.f32 %v331_v42 }
 0x190   :  { %1122 = vtanh.f32 %v326_v45  ;;  %v954_v47 = vpop.f32.mrb[4].mxu0 }
 0x191   :  { %v341_v48 = vadd.f32 %v954_v47, %v212_v44  ;;  %v335_v49 = vpop.f32.mrb[5].mxu0 }
 0x192   :  { %v336_v50 = vadd.f32 %v335_v49, %v207_v46  ;;  %v556_v49 = vld [vmem:[%s1498_s7 + $0x8] sm:$0xff] }
 0x193   :  { %1124 = vtanh.f32 %v341_v48 }
 0x194   :  { %1126 = vtanh.f32 %v336_v50  ;;  %v957_v52 = vpop.f32.mrb[6].mxu0  ;;  %v557_v50 = vld [vmem:[%s1498_s7 + $0x10] sm:$0xff] }
 0x195   :  { %v1117_v53 = vpop.eup %1116  ;;  %v351_v55 = vadd.f32 %v957_v52, %v222_v51  ;;  %v345_v56 = vpop.f32.mrb[7].mxu0  ;;  %v558_v51 = vld [vmem:[%s1498_s7 + $0x18] sm:$0xff]  ;;  %v559_v52 = vld [vmem:[%s1498_s7 + $0x20] sm:$0xff] }
 0x196   :  { %v1119_v57 = vpop.eup %1118  ;;  %v346_v58 = vadd.f32 %v345_v56, %v217_v54  ;;  %v561_v54 = vld [vmem:[%s1498_s7 + $0x30] sm:$0xff]  ;;  %v1189_v56 = vmov 0.0|0.0  }
 0x197   :  { %1128 = vtanh.f32 %v351_v55  ;;  %v1049_v59 = vpack.c.bf16 %v1117_v53, %v1119_v57  ;;  %v560_v53 = vld [vmem:[%s1498_s7 + $0x28] sm:$0xff]  ;;  %v562_v55 = vld [vmem:[%s1498_s7 + $0x38] sm:$0xff]  ;;  %v1191_v57 = vmov 0.0  }
 0x198   :  { %1130 = vtanh.f32 %v346_v58  ;;  %v579_v58 = vpop.permute.xlu1 %578 }
 0x199   :  { %v1121_v60 = vpop.eup %1120  ;;  %1050 = vmatprep.subr.bf16.mxu1 %v1049_v59 }
 0x19a   :  { %v1123_v61 = vpop.eup %1122  ;;  %1052 = vmatpush3.bf16.msra.mxu1 %v1049_v59  ;;  %v574_v59 = vpop.permute.xlu0 %573 }
 0x19b   :  { %v1053_v62 = vpack.c.bf16 %v1121_v60, %v1123_v61 }
 0x19c   :  { %v589_v60 = vpop.permute.xlu1 %588 }
 0x19d   :  { %v1125_v63 = vpop.eup %1124  ;;  %1054 = vmatprep.subr.bf16.mxu1 %v1053_v62 }
 0x19e   :  { %v1127_v0 = vpop.eup %1126  ;;  %1056 = vmatpush3.bf16.msra.mxu1 %v1053_v62  ;;  %v584_v62 = vpop.permute.xlu0 %583 }
 0x19f   :  { %v1057_v1 = vpack.c.bf16 %v1125_v63, %v1127_v0 }
 0x1a1   :  { %v1129_v2 = vpop.eup %1128  ;;  %1058 = vmatprep.subr.bf16.mxu1 %v1057_v1 }
 0x1a2   :  { %v1131_v3 = vpop.eup %1130  ;;  %1060 = vmatpush3.bf16.msra.mxu1 %v1057_v1 }
 0x1a3   :  { %v1061_v4 = vpack.c.bf16 %v1129_v2, %v1131_v3 }
 0x1a5   :  { %1062 = vmatprep.subr.bf16.mxu1 %v1061_v4 }
 0x1a6   :  { %1064 = vmatpush3.bf16.msra.mxu1 %v1061_v4 }
 0x1a7   :  { %1081 = vmatprep.subr.bf16.mxu1 %v1189_v56 }
 0x1a9   :  { %975 = vmatmul.mubr.msk.f32.vlgmr.msra.gmra.mrb[0].mxu1 %vm224_vm0, %v363_v5  ;;  %v599_v5 = vpop.permute.xlu1 %598 }
 0x1aa   :  { %977 = vmatprep.mubr.msk.f32.mxu1 %vm224_vm0, %v364_v6 }
 0x1ad   :  { %978 = vmatmul.mubr.msk.f32.gmra.mrb[2].mxu1 %vm224_vm0, %v365_v7  ;;  %v594_v7 = vpop.permute.xlu0 %593  ;;  %v609_v12 = vpop.permute.xlu1 %608 }
 0x1ae   :  { %980 = vmatprep.mubr.msk.f32.mxu1 %vm224_vm0, %v366_v8 }
 0x1b1   :  { %981 = vmatmul.mubr.msk.f32.gmra.mrb[4].mxu1 %vm224_vm0, %v367_v9 }
 0x1b2   :  { %983 = vmatprep.mubr.msk.f32.mxu1 %vm224_vm0, %v368_v10 }
 0x1b5   :  { %984 = vmatmul.mubr.msk.f32.gmra.mrb[6].mxu1 %vm224_vm0, %v369_v11 }
 0x1b6   :  { %1030 = vmatprep.mubr.msk.f32.mxu1 %vm1190_vm1, %v1191_v57 }
 0x27c   :  { %v976_v16 = vpop.f32.mrb[0].mxu1 }
 0x27d   :  { %v514_v18 = vadd.f32 %v976_v16, %v386_v13  ;;  %v508_v19 = vpop.f32.mrb[1].mxu1 }
 0x27e   :  { %v509_v20 = vadd.f32 %v508_v19, %v381_v14 }
 0x27f   :  { %1132 = vtanh.f32 %v514_v18 }
 0x280   :  { %1134 = vtanh.f32 %v509_v20  ;;  %v979_v21 = vpop.f32.mrb[2].mxu1 }
 0x281   :  { %v524_v22 = vadd.f32 %v979_v21, %v396_v15  ;;  %v518_v23 = vpop.f32.mrb[3].mxu1  ;;  %v604_v15 = vpop.permute.xlu0 %603 }
 0x282   :  { %v519_v25 = vadd.f32 %v518_v23, %v391_v17 }
 0x283   :  { %1136 = vtanh.f32 %v524_v22 }
 0x284   :  { %1138 = vtanh.f32 %v519_v25  ;;  %v982_v27 = vpop.f32.mrb[4].mxu1 }
 0x285   :  { %v534_v28 = vadd.f32 %v982_v27, %v406_v24  ;;  %v528_v29 = vpop.f32.mrb[5].mxu1 }
 0x286   :  { %v529_v30 = vadd.f32 %v528_v29, %v401_v26 }
 0x287   :  { %1140 = vtanh.f32 %v534_v28 }
 0x288   :  { %1142 = vtanh.f32 %v529_v30  ;;  %v985_v32 = vpop.f32.mrb[6].mxu1  ;;  %v748_v30 = vld [vmem:[%s1500_s9] sm:$0x1] }
 0x289   :  { %v1133_v33 = vpop.eup %1132  ;;  %v544_v35 = vadd.f32 %v985_v32, %v416_v31  ;;  %v538_v36 = vpop.f32.mrb[7].mxu1  ;;  %v755_v31 = vlaneseq }
 0x28a   :  { %v1135_v37 = vpop.eup %1134  ;;  %v539_v38 = vadd.f32 %v538_v36, %v411_v34  ;;  %v753_v34 = vpop.permute.xlu0 %752 }
 0x28b   :  { %1144 = vtanh.f32 %v544_v35  ;;  %v1065_v39 = vpack.c.bf16 %v1133_v33, %v1135_v37  ;;  %v756_v32 = vshrl.u32 %v755_v31, 7 }
 0x28c   :  { %1146 = vtanh.f32 %v539_v38 }
 0x28d   :  { %v1137_v40 = vpop.eup %1136  ;;  %1066 = vmatprep.subr.bf16.mxu0 %v1065_v39  ;;  %v757_v33 = vsub.s32 0, %v756_v32 }
 0x28e   :  { %v1139_v41 = vpop.eup %1138  ;;  %1068 = vmatpush3.bf16.msra.mxu0 %v1065_v39 }
 0x28f   :  { %v1069_v42 = vpack.c.bf16 %v1137_v40, %v1139_v41  ;;  %v758_v35 = vrot.slane %v753_v34, %v757_v33 }
 0x291   :  { %v1141_v43 = vpop.eup %1140  ;;  %1070 = vmatprep.subr.bf16.mxu0 %v1069_v42 }
 0x292   :  { %v1143_v44 = vpop.eup %1142  ;;  %1072 = vmatpush3.bf16.msra.mxu0 %v1069_v42 }
 0x293   :  { %v1073_v45 = vpack.c.bf16 %v1141_v43, %v1143_v44 }
 0x295   :  { %v1145_v46 = vpop.eup %1144  ;;  %1074 = vmatprep.subr.bf16.mxu0 %v1073_v45 }
 0x296   :  { %v1147_v47 = vpop.eup %1146  ;;  %1076 = vmatpush3.bf16.msra.mxu0 %v1073_v45 }
 0x297   :  { %v1077_v48 = vpack.c.bf16 %v1145_v46, %v1147_v47 }
 0x299   :  { %1078 = vmatprep.subr.bf16.mxu0 %v1077_v48 }
 0x29a   :  { %1080 = vmatpush3.bf16.msra.mxu0 %v1077_v48 }
 0x29d   :  { %1003 = vmatmul.mubr.msk.f32.vlgmr.msra.gmra.mrb[8].mxu0 %vm224_vm0, %v556_v49 }
 0x29e   :  { %1005 = vmatprep.mubr.msk.f32.mxu0 %vm224_vm0, %v557_v50 }
 0x2a1   :  { %1006 = vmatmul.mubr.msk.f32.gmra.mrb[10].mxu0 %vm224_vm0, %v558_v51 }
 0x2a2   :  { %1008 = vmatprep.mubr.msk.f32.mxu0 %vm224_vm0, %v559_v52 }
 0x2a5   :  { %1009 = vmatmul.mubr.msk.f32.gmra.mrb[12].mxu0 %vm224_vm0, %v560_v53 }
 0x2a6   :  { %1011 = vmatprep.mubr.msk.f32.mxu0 %vm224_vm0, %v561_v54 }
 0x2a9   :  { %1012 = vmatmul.mubr.msk.f32.gmra.mrb[14].mxu0 %vm224_vm0, %v562_v55 }
 0x370   :  { %v1004_v61 = vpop.f32.mrb[8].mxu0 }
 0x371   :  { %v707_v63 = vadd.f32 %v1004_v61, %v579_v58  ;;  %v701_v0 = vpop.f32.mrb[9].mxu0 }
 0x372   :  { %v702_v1 = vadd.f32 %v701_v0, %v574_v59 }
 0x373   :  { %1148 = vtanh.f32 %v707_v63 }
 0x374   :  { %1150 = vtanh.f32 %v702_v1  ;;  %v1007_v2 = vpop.f32.mrb[10].mxu0 }
 0x375   :  { %v717_v3 = vadd.f32 %v1007_v2, %v589_v60  ;;  %v711_v4 = vpop.f32.mrb[11].mxu0 }
 0x376   :  { %v712_v6 = vadd.f32 %v711_v4, %v584_v62 }
 0x377   :  { %1152 = vtanh.f32 %v717_v3 }
 0x378   :  { %1154 = vtanh.f32 %v712_v6  ;;  %v1010_v8 = vpop.f32.mrb[12].mxu0 }
 0x379   :  { %v727_v9 = vadd.f32 %v1010_v8, %v599_v5  ;;  %v721_v10 = vpop.f32.mrb[13].mxu0 }
 0x37a   :  { %v722_v11 = vadd.f32 %v721_v10, %v594_v7 }
 0x37b   :  { %1156 = vtanh.f32 %v727_v9 }
 0x37c   :  { %1158 = vtanh.f32 %v722_v11  ;;  %v1013_v13 = vpop.f32.mrb[14].mxu0 }
 0x37d   :  { %v1149_v14 = vpop.eup %1148  ;;  %v737_v16 = vadd.f32 %v1013_v13, %v609_v12  ;;  %v731_v17 = vpop.f32.mrb[15].mxu0 }
 0x37e   :  { %v1151_v18 = vpop.eup %1150  ;;  %v732_v19 = vadd.f32 %v731_v17, %v604_v15 }
 0x37f   :  { %1160 = vtanh.f32 %v737_v16  ;;  %v1082_v20 = vpack.c.bf16 %v1149_v14, %v1151_v18 }
 0x380   :  { %1162 = vtanh.f32 %v732_v19 }
 0x381   :  { %v1153_v21 = vpop.eup %1152  ;;  %1083 = vmatpush3.bf16.msra.mxu1 %v1082_v20 }
 0x382   :  { %v1155_v22 = vpop.eup %1154  ;;  %1084 = vmatprep.subr.bf16.mxu1 %v1189_v56 }
 0x383   :  { %v1085_v23 = vpack.c.bf16 %v1153_v21, %v1155_v22 }
 0x385   :  { %v1157_v24 = vpop.eup %1156  ;;  %1086 = vmatpush3.bf16.msra.mxu1 %v1085_v23 }
 0x386   :  { %v1159_v25 = vpop.eup %1158  ;;  %1087 = vmatprep.subr.bf16.mxu1 %v1189_v56 }
 0x387   :  { %v1088_v26 = vpack.c.bf16 %v1157_v24, %v1159_v25 }
 0x389   :  { %v1161_v27 = vpop.eup %1160  ;;  %1089 = vmatpush3.bf16.msra.mxu1 %v1088_v26 }
 0x38a   :  { %v1163_v28 = vpop.eup %1162  ;;  %1090 = vmatprep.subr.bf16.mxu1 %v1189_v56 }
 0x38b   :  { %v1091_v29 = vpack.c.bf16 %v1161_v27, %v1163_v28 }
 0x38d   :  { %1092 = vmatpush3.bf16.msra.mxu1 %v1091_v29 }
 0x390   :  { %1031 = vmatmul.mubr.msk.f32.vlgmr.msra.gmra.mrb[8].mxu1 %vm224_vm0, %v748_v30 }
 0x463   :  { %v828_v36 = vpop.f32.mrb[8].mxu1 }
 0x464   :  { %v829_v37 = vadd.f32 %v828_v36, %v758_v35  ;;  %v1032_v38 = vpop.f32.mrb[9].mxu1 }
 0x466   :  { %832 = vst [vmem:[#allocation3] sm:$0x1] %v829_v37 }
 0x467   :  { %1175 = shalt.err (!%p1172_p4)
}
 0x468   :  { %s1176_s13 = scalar_lea.hbm %s1502_s11, 16 }
 0x469   :  { %p1177_p5 = scmp.ne.s32.totalorder %s1502_s11, %s1176_s13  ;;  %p1180_p6 = scmp.lt.u32.totalorder %s1176_s13, %s1502_s11 }
 0x46b   :  { %p1182_p7 = pnand %p1180_p6, %p1177_p5 }
 0x46d   :  { %1185 = shalt.err (!%p1182_p7)
}
 0x46e   :  { %842 = dma.vmem_to_hbm [thread:$0]  %s840_s29, 16, %s1502_s11, [#allocation4]  }
 0x46f   :  { %1186 = dma.done.wait [#allocation4], 16  }
 0x470   :  { %1187 = vsyncadd [#allocation4], 4294967280 }
 0x471   :  { %846 = vsyncpa [#allocation4], 1 }

</bundles_post_ra>
